<compile_context>
chip_gen: v7x
topology: tpu7x:2x2x1
jax: 0.10.0
libtpu: 0.0.40
codegen_flags: <defaults>
</compile_context>

<pallas_src>
import functools

import jax
import jax.numpy as jnp
from jax.experimental import pallas as pl
from jax.experimental.pallas import tpu as pltpu


def _round_up(x, m):
    return (x + m - 1) // m * m


def _recip(x):
    # EUP approximate reciprocal + one Newton step (~1e-7 relative error):
    # moves softmax-denominator divides off the VPU onto the mostly-idle EUP.
    y = pl.reciprocal(x, approx=True)
    return y * (2.0 - x * y)


def adaptive_ensemble_kernel(scalars_ref, preds_ref,
                             w1_ref, b1_ref, w2_ref, b2_ref, w3_ref, b3_ref,
                             ew_ref, logits_ref, weights_ref):
    # scalars_ref: (2,) SMEM  [temperature, fw_shift]
    # preds_ref:   (M, C, TB) batch on lanes, classes (unpadded) on sublanes
    # w1_ref: (M, H1, C)  b1_ref: (H1, 1)
    # w2_ref: (H2, H1)    b2_ref: (H2, 1)
    # w3_ref: (M, H2)     b3_ref: (M, 1)
    # ew_ref: (M, 1)
    # logits_ref: (CP? no -> C, TB)   weights_ref: (M, TB)
    M, C, TB = preds_ref.shape

    inv_t = 1.0 / scalars_ref[0]          # exact scalar reciprocal, once
    fw_shift = scalars_ref[1]

    # Per-model, temperature-scaled, numerically stable softmax over the class
    # (sublane) axis for all M models at once.  C=5 is a sub-tile sublane
    # extent; Mosaic masks the reductions, so no class padding is ever DMA'd.
    scaled = preds_ref[...] * inv_t                         # (M, C, TB)
    mx = jnp.max(scaled, axis=1, keepdims=True)             # (M, 1, TB)
    e = jnp.exp(scaled - mx)
    probs = e * _recip(jnp.sum(e, axis=1, keepdims=True))   # (M, C, TB)

    # Confidence-network layer 1 as M small K=C MXU dots.  torch flatten order
    # is model-major, so summing per-model slabs equals the single K=M*C dot;
    # this avoids reshaping the non-8-aligned class axis (no relayout).
    h1 = jnp.dot(w1_ref[0], probs[0], preferred_element_type=jnp.float32)
    for m in range(1, M):
        h1 = h1 + jnp.dot(w1_ref[m], probs[m],
                          preferred_element_type=jnp.float32)
    h1 = jnp.maximum(h1 + b1_ref[...], 0.0)                 # (H1, TB)

    h2 = jnp.maximum(
        jnp.dot(w2_ref[...], h1, preferred_element_type=jnp.float32)
        + b2_ref[...], 0.0)                                 # (H2, TB)
    cl = (jnp.dot(w3_ref[...], h2, preferred_element_type=jnp.float32)
          + b3_ref[...])                                    # (M, TB)

    # Softmax over models (sublane axis).
    cmx = jnp.max(cl, axis=0, keepdims=True)
    ce = jnp.exp(cl - cmx)
    conf = ce * _recip(jnp.sum(ce, axis=0, keepdims=True))  # (M, TB)

    # Final-weights softmax.  conf in (0, 1] => conf*ew <= max(ew, 0), which is
    # the host-computed fw_shift scalar: subtracting it keeps exp() <= 1
    # without paying an XLU cross-sublane max every step.
    fe = jnp.exp(conf * ew_ref[...] - fw_shift)             # (M, TB)
    fw = fe * _recip(jnp.sum(fe, axis=0, keepdims=True))
    weights_ref[...] = fw

    # Weighted combine: sum over the model (major) axis.
    ens = jnp.sum(probs * fw[:, None, :], axis=0)           # (C, TB)
    logits_ref[...] = jnp.log(ens + 1e-8)


@functools.partial(jax.jit, static_argnames=("block_b",))
def adaptive_ensemble(preds, temperature, w1, b1, w2, b2, w3, b3,
                      ensemble_weights, *, block_b=2048):
    """AdaptiveEnsemble forward (PyTorch-native parameter layouts).

    Args:
      preds:            (M, B, C) stacked model logits.
      temperature:      (1,)
      w1, b1:           nn.Linear(M*C, H1):  w1 (H1, M*C), b1 (H1,)
      w2, b2:           nn.Linear(H1, H2):   w2 (H2, H1),  b2 (H2,)
      w3, b3:           nn.Linear(H2, M):    w3 (M, H2),   b3 (M,)
      ensemble_weights: (M,)
    Returns:
      (ensemble_logits (B, C) float32, final_weights (B, M) float32)
    """
    M, B, C = preds.shape
    H1 = w1.shape[0]
    H2 = w2.shape[0]
    f32 = jnp.float32

    # Lane-dense batch tile.  block_b=2048 keeps per-step VMEM at a few MiB
    # (fits v5e/v6e/v7x) while amortizing the ~0.35us/step pipeline overhead;
    # for mid-size batches TB is capped so the "parallel" grid has >= 2 steps
    # and can feed both v7x TensorCores (no effect on single-TC v5e/v6e).
    TB = _round_up(min(block_b, B), 128)
    if B > 128:
        TB = min(TB, max(128, _round_up(-(-B // 2), 128)))
    grid = (pl.cdiv(B, TB),)   # ragged last block: OOB lanes read undefined
                               # data, OOB writes dropped; reductions are all
                               # sublane/major-axis so garbage lanes are inert.

    # Single fused relayout pass under jit: batch onto lanes, no class pad,
    # no batch pad.
    preds_t = jnp.transpose(preds.astype(f32), (0, 2, 1))       # (M, C, B)

    # Layer-1 weight regrouped per model slab: w1_r[m, h, c] = w1[h, m*C + c].
    w1_r = jnp.transpose(w1.astype(f32).reshape(H1, M, C), (1, 0, 2))
    b1c = b1.astype(f32).reshape(H1, 1)
    w2f = w2.astype(f32)
    b2c = b2.astype(f32).reshape(H2, 1)
    w3f = w3.astype(f32)
    b3c = b3.astype(f32).reshape(M, 1)
    ewc = ensemble_weights.astype(f32).reshape(M, 1)

    # SMEM scalars: [temperature, fw_shift].  fw_shift = max(ew, 0) bounds
    # conf*ew from above since conf <= 1 (only breaks for |ew| ~ 100, which a
    # learned near-uniform ensemble weight never reaches).
    fw_shift = jnp.maximum(jnp.max(ensemble_weights.astype(f32)), 0.0)
    scalars = jnp.concatenate([temperature.astype(f32).reshape(1),
                               fw_shift.reshape(1)])

    # Weights/biases: full-array blocks with constant index maps -> DMA'd once,
    # VMEM-resident across all grid steps.
    def const_spec(shape):
        zeros = (0,) * len(shape)
        return pl.BlockSpec(shape, lambda i, _z=zeros: _z)

    out_shape = (jax.ShapeDtypeStruct((C, B), f32),
                 jax.ShapeDtypeStruct((M, B), f32))

    logits_p, weights_p = pl.pallas_call(
        adaptive_ensemble_kernel,
        out_shape=out_shape,
        grid=grid,
        in_specs=[
            pl.BlockSpec(memory_space=pltpu.MemorySpace.SMEM),    # scalars
            pl.BlockSpec((M, C, TB), lambda i: (0, 0, i)),        # predictions
            const_spec((M, H1, C)), const_spec((H1, 1)),          # layer 1
            const_spec((H2, H1)), const_spec((H2, 1)),            # layer 2
            const_spec((M, H2)), const_spec((M, 1)),              # layer 3
            const_spec((M, 1)),                                   # ensemble w
        ],
        out_specs=(pl.BlockSpec((C, TB), lambda i: (0, i)),
                   pl.BlockSpec((M, TB), lambda i: (0, i))),
        compiler_params=pltpu.CompilerParams(
            dimension_semantics=("parallel",),
            vmem_limit_bytes=32 * 1024 * 1024),
    )(scalars, preds_t, w1_r, b1c, w2f, b2c, w3f, b3c, ewc)

    # Layout plumbing back to the module's (B, C)/(B, M) convention; fuses with
    # downstream consumers under jit.
    return logits_p.T, weights_p.T


def reference(preds, temperature, w1, b1, w2, b2, w3, b3, ew):
    """Pure-JAX reference mirroring the PyTorch module (eval mode)."""
    M, B, C = preds.shape
    probs = jax.nn.softmax(preds / temperature[0], axis=-1)          # (M, B, C)
    flat = jnp.transpose(probs, (1, 0, 2)).reshape(B, M * C)         # (B, M*C)
    h1 = jax.nn.relu(flat @ w1.T + b1)
    h2 = jax.nn.relu(h1 @ w2.T + b2)
    conf = jax.nn.softmax(h2 @ w3.T + b3, axis=-1)
    fw = jax.nn.softmax(conf * ew[None, :], axis=-1)
    ens = jnp.einsum('mbc,bm->bc', probs, fw)
    return jnp.log(ens + 1e-8), fw


if __name__ == "__main__":
    B = 8
    M, C, H1, H2 = 4, 5, 128, 64

    key = jax.random.PRNGKey(0)
    kp, k1, k2, k3 = jax.random.split(key, 4)

    # Deterministic "model predictions": M logits tensors of shape (B, C).
    preds = jax.random.normal(kp, (M, B, C), jnp.float32) * 2.0

    # Deterministic parameters in PyTorch-native layouts.
    w1 = jax.random.normal(k1, (H1, M * C), jnp.float32) * 0.1   # Linear(M*C,128).weight
    b1 = jnp.full((H1,), 0.01, jnp.float32)
    w2 = jax.random.normal(k2, (H2, H1), jnp.float32) * 0.1      # Linear(128,64).weight
    b2 = jnp.full((H2,), 0.01, jnp.float32)
    w3 = jax.random.normal(k3, (M, H2), jnp.float32) * 0.1       # Linear(64,M).weight
    b3 = jnp.zeros((M,), jnp.float32)
    ensemble_weights = jnp.full((M,), 1.0 / M, jnp.float32)      # ones(M)/M
    temperature = jnp.ones((1,), jnp.float32)                    # ones(1)

    logits, weights = adaptive_ensemble(
        preds, temperature, w1, b1, w2, b2, w3, b3, ensemble_weights)
    jax.block_until_ready((logits, weights))

    ref_logits, ref_weights = reference(
        preds, temperature, w1, b1, w2, b2, w3, b3, ensemble_weights)

    assert logits.shape == (B, C) and weights.shape == (B, M)
    assert jnp.allclose(logits, ref_logits, atol=1e-5, rtol=1e-5)
    assert jnp.allclose(weights, ref_weights, atol=1e-5, rtol=1e-5)

    print("KERNEL_OK")
</pallas_src>

<mosaic_0001>
module attributes {stable_mosaic.version = 11 : i64} {
  func.func @adaptive_ensemble_kernel(%arg0: i32, %arg1: memref<2xf32, #tpu.memory_space<smem>>, %arg2: memref<4x5x128xf32, #tpu.memory_space<vmem>>, %arg3: memref<4x128x5xf32, #tpu.memory_space<vmem>>, %arg4: memref<128x1xf32, #tpu.memory_space<vmem>>, %arg5: memref<64x128xf32, #tpu.memory_space<vmem>>, %arg6: memref<64x1xf32, #tpu.memory_space<vmem>>, %arg7: memref<4x64xf32, #tpu.memory_space<vmem>>, %arg8: memref<4x1xf32, #tpu.memory_space<vmem>>, %arg9: memref<4x1xf32, #tpu.memory_space<vmem>>, %arg10: memref<5x128xf32, #tpu.memory_space<vmem>>, %arg11: memref<4x128xf32, #tpu.memory_space<vmem>>) attributes {dimension_semantics = [#tpu.dimension_semantics<parallel>], iteration_bounds = array<i64: 1>, scalar_prefetch = 0 : i64, scratch_operands = 0 : i64, tpu.core_type = #tpu.core_type<tc>, window_params = [{transform_indices = @transform_0, window_bounds = array<i64: 2>}, {transform_indices = @transform_1, window_bounds = array<i64: 4, 5, 128>}, {pipeline_mode = #tpu.pipeline_mode<synchronous>, transform_indices = @transform_2, window_bounds = array<i64: 4, 128, 5>}, {pipeline_mode = #tpu.pipeline_mode<synchronous>, transform_indices = @transform_3, window_bounds = array<i64: 128, 1>}, {pipeline_mode = #tpu.pipeline_mode<synchronous>, transform_indices = @transform_4, window_bounds = array<i64: 64, 128>}, {pipeline_mode = #tpu.pipeline_mode<synchronous>, transform_indices = @transform_5, window_bounds = array<i64: 64, 1>}, {pipeline_mode = #tpu.pipeline_mode<synchronous>, transform_indices = @transform_6, window_bounds = array<i64: 4, 64>}, {pipeline_mode = #tpu.pipeline_mode<synchronous>, transform_indices = @transform_7, window_bounds = array<i64: 4, 1>}, {pipeline_mode = #tpu.pipeline_mode<synchronous>, transform_indices = @transform_8, window_bounds = array<i64: 4, 1>}, {transform_indices = @transform_9, window_bounds = array<i64: 5, 128>}, {transform_indices = @transform_10, window_bounds = array<i64: 4, 128>}]} {
    %c0 = arith.constant 0 : index
    %0 = memref.load %arg1[%c0] : memref<2xf32, #tpu.memory_space<smem>>
    %cst = arith.constant 1.000000e+00 : f32
    %1 = arith.divf %cst, %0 : f32
    %c1 = arith.constant 1 : index
    %2 = memref.load %arg1[%c1] : memref<2xf32, #tpu.memory_space<smem>>
    %c0_0 = arith.constant 0 : index
    %c0_1 = arith.constant 0 : index
    %c0_2 = arith.constant 0 : index
    %3 = vector.load %arg2[%c0_0, %c0_1, %c0_2] : memref<4x5x128xf32, #tpu.memory_space<vmem>>, vector<4x5x128xf32>
    %4 = vector.broadcast %1 : f32 to vector<4x5x128xf32>
    %5 = arith.mulf %3, %4 : vector<4x5x128xf32>
    %cst_3 = arith.constant dense<0xFF800000> : vector<4x128xf32>
    %6 = vector.multi_reduction <maximumf>, %5, %cst_3 [1] : vector<4x5x128xf32> to vector<4x128xf32>
    %7 = vector.shape_cast %6 : vector<4x128xf32> to vector<4x1x128xf32>
    %8 = vector.broadcast %7 : vector<4x1x128xf32> to vector<4x5x128xf32>
    %9 = arith.subf %5, %8 : vector<4x5x128xf32>
    %10 = math.exp %9 : vector<4x5x128xf32>
    %cst_4 = arith.constant dense<0.000000e+00> : vector<4x128xf32>
    %11 = vector.multi_reduction <add>, %10, %cst_4 [1] : vector<4x5x128xf32> to vector<4x128xf32>
    %12 = vector.shape_cast %11 : vector<4x128xf32> to vector<4x1x128xf32>
    %13 = tpu.reciprocal %12 {approx = true} : vector<4x1x128xf32> -> vector<4x1x128xf32>
    %14 = arith.mulf %12, %13 : vector<4x1x128xf32>
    %cst_5 = arith.constant 2.000000e+00 : f32
    %15 = vector.broadcast %cst_5 : f32 to vector<4x1x128xf32>
    %16 = arith.subf %15, %14 : vector<4x1x128xf32>
    %17 = arith.mulf %13, %16 : vector<4x1x128xf32>
    %18 = vector.broadcast %17 : vector<4x1x128xf32> to vector<4x5x128xf32>
    %19 = arith.mulf %10, %18 : vector<4x5x128xf32>
    %c0_6 = arith.constant 0 : index
    %c0_7 = arith.constant 0 : index
    %c0_8 = arith.constant 0 : index
    %20 = vector.load %arg3[%c0_6, %c0_7, %c0_8] : memref<4x128x5xf32, #tpu.memory_space<vmem>>, vector<1x128x5xf32>
    %21 = vector.shape_cast %20 : vector<1x128x5xf32> to vector<128x5xf32>
    %22 = vector.extract_strided_slice %19 {offsets = [0, 0, 0], sizes = [1, 5, 128], strides = [1, 1, 1]} : vector<4x5x128xf32> to vector<1x5x128xf32>
    %23 = vector.shape_cast %22 : vector<1x5x128xf32> to vector<5x128xf32>
    %cst_9 = arith.constant dense<0.000000e+00> : vector<128x128xf32>
    %24 = tpu.matmul %21, %23, %cst_9 {dimension_numbers = #tpu.dot_dimension_numbers<[1], [0], [0], [1], [0, 0, 1, 1], [], []>} : vector<128x5xf32>, vector<5x128xf32>, vector<128x128xf32> -> vector<128x128xf32>
    %c1_10 = arith.constant 1 : index
    %c0_11 = arith.constant 0 : index
    %c0_12 = arith.constant 0 : index
    %25 = vector.load %arg3[%c1_10, %c0_11, %c0_12] : memref<4x128x5xf32, #tpu.memory_space<vmem>>, vector<1x128x5xf32>
    %26 = vector.shape_cast %25 : vector<1x128x5xf32> to vector<128x5xf32>
    %27 = vector.extract_strided_slice %19 {offsets = [1, 0, 0], sizes = [1, 5, 128], strides = [1, 1, 1]} : vector<4x5x128xf32> to vector<1x5x128xf32>
    %28 = vector.shape_cast %27 : vector<1x5x128xf32> to vector<5x128xf32>
    %cst_13 = arith.constant dense<0.000000e+00> : vector<128x128xf32>
    %29 = tpu.matmul %26, %28, %cst_13 {dimension_numbers = #tpu.dot_dimension_numbers<[1], [0], [0], [1], [0, 0, 1, 1], [], []>} : vector<128x5xf32>, vector<5x128xf32>, vector<128x128xf32> -> vector<128x128xf32>
    %30 = arith.addf %24, %29 : vector<128x128xf32>
    %c2 = arith.constant 2 : index
    %c0_14 = arith.constant 0 : index
    %c0_15 = arith.constant 0 : index
    %31 = vector.load %arg3[%c2, %c0_14, %c0_15] : memref<4x128x5xf32, #tpu.memory_space<vmem>>, vector<1x128x5xf32>
    %32 = vector.shape_cast %31 : vector<1x128x5xf32> to vector<128x5xf32>
    %33 = vector.extract_strided_slice %19 {offsets = [2, 0, 0], sizes = [1, 5, 128], strides = [1, 1, 1]} : vector<4x5x128xf32> to vector<1x5x128xf32>
    %34 = vector.shape_cast %33 : vector<1x5x128xf32> to vector<5x128xf32>
    %cst_16 = arith.constant dense<0.000000e+00> : vector<128x128xf32>
    %35 = tpu.matmul %32, %34, %cst_16 {dimension_numbers = #tpu.dot_dimension_numbers<[1], [0], [0], [1], [0, 0, 1, 1], [], []>} : vector<128x5xf32>, vector<5x128xf32>, vector<128x128xf32> -> vector<128x128xf32>
    %36 = arith.addf %30, %35 : vector<128x128xf32>
    %c3 = arith.constant 3 : index
    %c0_17 = arith.constant 0 : index
    %c0_18 = arith.constant 0 : index
    %37 = vector.load %arg3[%c3, %c0_17, %c0_18] : memref<4x128x5xf32, #tpu.memory_space<vmem>>, vector<1x128x5xf32>
    %38 = vector.shape_cast %37 : vector<1x128x5xf32> to vector<128x5xf32>
    %39 = vector.extract_strided_slice %19 {offsets = [3, 0, 0], sizes = [1, 5, 128], strides = [1, 1, 1]} : vector<4x5x128xf32> to vector<1x5x128xf32>
    %40 = vector.shape_cast %39 : vector<1x5x128xf32> to vector<5x128xf32>
    %cst_19 = arith.constant dense<0.000000e+00> : vector<128x128xf32>
    %41 = tpu.matmul %38, %40, %cst_19 {dimension_numbers = #tpu.dot_dimension_numbers<[1], [0], [0], [1], [0, 0, 1, 1], [], []>} : vector<128x5xf32>, vector<5x128xf32>, vector<128x128xf32> -> vector<128x128xf32>
    %42 = arith.addf %36, %41 : vector<128x128xf32>
    %c0_20 = arith.constant 0 : index
    %c0_21 = arith.constant 0 : index
    %43 = vector.load %arg4[%c0_20, %c0_21] : memref<128x1xf32, #tpu.memory_space<vmem>>, vector<128x1xf32>
    %44 = vector.broadcast %43 : vector<128x1xf32> to vector<128x128xf32>
    %45 = arith.addf %42, %44 : vector<128x128xf32>
    %cst_22 = arith.constant 0.000000e+00 : f32
    %46 = vector.broadcast %cst_22 : f32 to vector<128x128xf32>
    %47 = arith.maximumf %45, %46 : vector<128x128xf32>
    %c0_23 = arith.constant 0 : index
    %c0_24 = arith.constant 0 : index
    %48 = vector.load %arg5[%c0_23, %c0_24] : memref<64x128xf32, #tpu.memory_space<vmem>>, vector<64x128xf32>
    %cst_25 = arith.constant dense<0.000000e+00> : vector<64x128xf32>
    %49 = tpu.matmul %48, %47, %cst_25 {dimension_numbers = #tpu.dot_dimension_numbers<[1], [0], [0], [1], [0, 0, 1, 1], [], []>} : vector<64x128xf32>, vector<128x128xf32>, vector<64x128xf32> -> vector<64x128xf32>
    %c0_26 = arith.constant 0 : index
    %c0_27 = arith.constant 0 : index
    %50 = vector.load %arg6[%c0_26, %c0_27] : memref<64x1xf32, #tpu.memory_space<vmem>>, vector<64x1xf32>
    %51 = vector.broadcast %50 : vector<64x1xf32> to vector<64x128xf32>
    %52 = arith.addf %49, %51 : vector<64x128xf32>
    %cst_28 = arith.constant 0.000000e+00 : f32
    %53 = vector.broadcast %cst_28 : f32 to vector<64x128xf32>
    %54 = arith.maximumf %52, %53 : vector<64x128xf32>
    %c0_29 = arith.constant 0 : index
    %c0_30 = arith.constant 0 : index
    %55 = vector.load %arg7[%c0_29, %c0_30] : memref<4x64xf32, #tpu.memory_space<vmem>>, vector<4x64xf32>
    %cst_31 = arith.constant dense<0.000000e+00> : vector<4x128xf32>
    %56 = tpu.matmul %55, %54, %cst_31 {dimension_numbers = #tpu.dot_dimension_numbers<[1], [0], [0], [1], [0, 0, 1, 1], [], []>} : vector<4x64xf32>, vector<64x128xf32>, vector<4x128xf32> -> vector<4x128xf32>
    %c0_32 = arith.constant 0 : index
    %c0_33 = arith.constant 0 : index
    %57 = vector.load %arg8[%c0_32, %c0_33] : memref<4x1xf32, #tpu.memory_space<vmem>>, vector<4x1xf32>
    %58 = vector.broadcast %57 : vector<4x1xf32> to vector<4x128xf32>
    %59 = arith.addf %56, %58 : vector<4x128xf32>
    %cst_34 = arith.constant dense<0xFF800000> : vector<128xf32>
    %60 = vector.multi_reduction <maximumf>, %59, %cst_34 [0] : vector<4x128xf32> to vector<128xf32>
    %61 = vector.shape_cast %60 : vector<128xf32> to vector<1x128xf32>
    %62 = vector.broadcast %61 : vector<1x128xf32> to vector<4x128xf32>
    %63 = arith.subf %59, %62 : vector<4x128xf32>
    %64 = math.exp %63 : vector<4x128xf32>
    %cst_35 = arith.constant dense<0.000000e+00> : vector<128xf32>
    %65 = vector.multi_reduction <add>, %64, %cst_35 [0] : vector<4x128xf32> to vector<128xf32>
    %66 = vector.shape_cast %65 : vector<128xf32> to vector<1x128xf32>
    %67 = tpu.reciprocal %66 {approx = true} : vector<1x128xf32> -> vector<1x128xf32>
    %68 = arith.mulf %66, %67 : vector<1x128xf32>
    %cst_36 = arith.constant 2.000000e+00 : f32
    %69 = vector.broadcast %cst_36 : f32 to vector<1x128xf32>
    %70 = arith.subf %69, %68 : vector<1x128xf32>
    %71 = arith.mulf %67, %70 : vector<1x128xf32>
    %72 = vector.broadcast %71 : vector<1x128xf32> to vector<4x128xf32>
    %73 = arith.mulf %64, %72 : vector<4x128xf32>
    %c0_37 = arith.constant 0 : index
    %c0_38 = arith.constant 0 : index
    %74 = vector.load %arg9[%c0_37, %c0_38] : memref<4x1xf32, #tpu.memory_space<vmem>>, vector<4x1xf32>
    %75 = vector.broadcast %74 : vector<4x1xf32> to vector<4x128xf32>
    %76 = arith.mulf %73, %75 : vector<4x128xf32>
    %77 = vector.broadcast %2 : f32 to vector<4x128xf32>
    %78 = arith.subf %76, %77 : vector<4x128xf32>
    %79 = math.exp %78 : vector<4x128xf32>
    %cst_39 = arith.constant dense<0.000000e+00> : vector<128xf32>
    %80 = vector.multi_reduction <add>, %79, %cst_39 [0] : vector<4x128xf32> to vector<128xf32>
    %81 = vector.shape_cast %80 : vector<128xf32> to vector<1x128xf32>
    %82 = tpu.reciprocal %81 {approx = true} : vector<1x128xf32> -> vector<1x128xf32>
    %83 = arith.mulf %81, %82 : vector<1x128xf32>
    %cst_40 = arith.constant 2.000000e+00 : f32
    %84 = vector.broadcast %cst_40 : f32 to vector<1x128xf32>
    %85 = arith.subf %84, %83 : vector<1x128xf32>
    %86 = arith.mulf %82, %85 : vector<1x128xf32>
    %87 = vector.broadcast %86 : vector<1x128xf32> to vector<4x128xf32>
    %88 = arith.mulf %79, %87 : vector<4x128xf32>
    %c0_41 = arith.constant 0 : index
    %c0_42 = arith.constant 0 : index
    %89 = vector.load %arg11[%c0_41, %c0_42] : memref<4x128xf32, #tpu.memory_space<vmem>>, vector<4x128xf32>
    tpu.vector_store %arg11[%c0_41, %c0_42], %88 {strides = array<i32>} : memref<4x128xf32, #tpu.memory_space<vmem>>, vector<4x128xf32>,
    %90 = vector.shape_cast %88 : vector<4x128xf32> to vector<4x1x128xf32>
    %91 = vector.broadcast %90 : vector<4x1x128xf32> to vector<4x5x128xf32>
    %92 = arith.mulf %19, %91 : vector<4x5x128xf32>
    %cst_43 = arith.constant dense<0.000000e+00> : vector<5x128xf32>
    %93 = vector.multi_reduction <add>, %92, %cst_43 [0] : vector<4x5x128xf32> to vector<5x128xf32>
    %cst_44 = arith.constant 9.99999993E-9 : f32
    %94 = vector.broadcast %cst_44 : f32 to vector<5x128xf32>
    %95 = arith.addf %93, %94 : vector<5x128xf32>
    %96 = math.log %95 : vector<5x128xf32>
    %c0_45 = arith.constant 0 : index
    %c0_46 = arith.constant 0 : index
    %97 = vector.load %arg10[%c0_45, %c0_46] : memref<5x128xf32, #tpu.memory_space<vmem>>, vector<5x128xf32>
    tpu.vector_store %arg10[%c0_45, %c0_46], %96 {strides = array<i32>} : memref<5x128xf32, #tpu.memory_space<vmem>>, vector<5x128xf32>,
    return
  }
  func.func @transform_0(%arg0: i32) -> i32 {
    %c0_i32 = arith.constant 0 : i32
    %c0_i32_0 = arith.constant 0 : i32
    return %c0_i32 : i32
  }
  func.func @transform_1(%arg0: i32) -> (i32, i32, i32) {
    %c0_i32 = arith.constant 0 : i32
    %c0_i32_0 = arith.constant 0 : i32
    %c0_i32_1 = arith.constant 0 : i32
    return %c0_i32, %c0_i32_0, %arg0 : i32, i32, i32
  }
  func.func @transform_2(%arg0: i32) -> (i32, i32, i32) {
    %c0_i32 = arith.constant 0 : i32
    %c0_i32_0 = arith.constant 0 : i32
    %c0_i32_1 = arith.constant 0 : i32
    %c0_i32_2 = arith.constant 0 : i32
    return %c0_i32, %c0_i32_0, %c0_i32_1 : i32, i32, i32
  }
  func.func @transform_3(%arg0: i32) -> (i32, i32) {
    %c0_i32 = arith.constant 0 : i32
    %c0_i32_0 = arith.constant 0 : i32
    %c0_i32_1 = arith.constant 0 : i32
    return %c0_i32, %c0_i32_0 : i32, i32
  }
  func.func @transform_4(%arg0: i32) -> (i32, i32) {
    %c0_i32 = arith.constant 0 : i32
    %c0_i32_0 = arith.constant 0 : i32
    %c0_i32_1 = arith.constant 0 : i32
    return %c0_i32, %c0_i32_0 : i32, i32
  }
  func.func @transform_5(%arg0: i32) -> (i32, i32) {
    %c0_i32 = arith.constant 0 : i32
    %c0_i32_0 = arith.constant 0 : i32
    %c0_i32_1 = arith.constant 0 : i32
    return %c0_i32, %c0_i32_0 : i32, i32
  }
  func.func @transform_6(%arg0: i32) -> (i32, i32) {
    %c0_i32 = arith.constant 0 : i32
    %c0_i32_0 = arith.constant 0 : i32
    %c0_i32_1 = arith.constant 0 : i32
    return %c0_i32, %c0_i32_0 : i32, i32
  }
  func.func @transform_7(%arg0: i32) -> (i32, i32) {
    %c0_i32 = arith.constant 0 : i32
    %c0_i32_0 = arith.constant 0 : i32
    %c0_i32_1 = arith.constant 0 : i32
    return %c0_i32, %c0_i32_0 : i32, i32
  }
  func.func @transform_8(%arg0: i32) -> (i32, i32) {
    %c0_i32 = arith.constant 0 : i32
    %c0_i32_0 = arith.constant 0 : i32
    %c0_i32_1 = arith.constant 0 : i32
    return %c0_i32, %c0_i32_0 : i32, i32
  }
  func.func @transform_9(%arg0: i32) -> (i32, i32) {
    %c0_i32 = arith.constant 0 : i32
    %c0_i32_0 = arith.constant 0 : i32
    return %c0_i32, %arg0 : i32, i32
  }
  func.func @transform_10(%arg0: i32) -> (i32, i32) {
    %c0_i32 = arith.constant 0 : i32
    %c0_i32_0 = arith.constant 0 : i32
    return %c0_i32, %arg0 : i32, i32
  }
}

</mosaic_0001>

<bundles_post_ra>
// kernel: adaptive_ensemble.1
= control target key start
LH: loop header
LB: loop body
LE: loop exit
PB: predicated region body
PF: predicated region fallthrough
CT: control target
= control target key end

     0   :  { %16 = vsyncpa [#allocation4], 0  ;;  %s2612_s0 = inlined_call_operand.vmem [shape: f32[2], index: 0, kind: input, shape index: {}]   ;;  %s2613_s1 = inlined_call_operand.vmem [shape: f32[4,5,8], index: 1, kind: input, shape index: {}]   ;;  %s2614_s2 = inlined_call_operand.vmem [shape: f32[4,128,5], index: 2, kind: input, shape index: {}]   ;;  %s2615_s3 = inlined_call_operand.vmem [shape: f32[128,1], index: 3, kind: input, shape index: {}]   ;;  %s2616_s4 = inlined_call_operand.vmem [shape: f32[64,128], index: 4, kind: input, shape index: {}]   ;;  %s2617_s5 = inlined_call_operand.vmem [shape: f32[64,1], index: 5, kind: input, shape index: {}]   ;;  %s2618_s6 = inlined_call_operand.vmem [shape: f32[4,64], index: 6, kind: input, shape index: {}]   ;;  %s2619_s7 = inlined_call_operand.vmem [shape: f32[4,1], index: 7, kind: input, shape index: {}]   ;;  %s2620_s8 = inlined_call_operand.vmem [shape: f32[4,1], index: 8, kind: input, shape index: {}]   ;;  %s2621_s9 = inlined_call_operand.vmem [shape: f32[5,8], index: 9, kind: output, shape index: {0}]   ;;  %s2622_s10 = inlined_call_operand.hbm [shape: f32[4,8], index: 10, kind: output, shape index: {1}]  }
   0x1   :  { %17 = vsyncpa [#allocation3], 0  ;;  %s24_s15 = sshll.u32 %s2612_s0, 4  ;;  %s25_s15 = int_to_ptr.vmem [resolvable:$true] %s24_s15 }
   0x2   :  { %s2058_s16 = scalar_lea.vmem %s25_s15, 16  ;;  %p2063_p1 = scmp.lt.s32.totalorder %s25_s15, %s25_s15 }
   0x3   :  { %p2059_p0 = scmp.ne.s32.totalorder %s25_s15, %s2058_s16  ;;  %p2064_p2 = scmp.lt.s32.totalorder %s2058_s16, %s2058_s16 }
   0x5   :  { %p2065_p3 = por %p2064_p2, %p2063_p1 }
   0x7   :  { %p2066_p4 = pnand %p2065_p3, %p2059_p0 }
   0x9   :  { %2069 = shalt.err (!%p2066_p4)
}
   0xa   :  { %s2096_s17 = smov [#allocation2]  }
   0xb   :  { %27 = dma.vmem_to_smem %s25_s15, 16, %s2096_s17, [#allocation4]  }
   0xc   :  { %2092 = dma.done.wait [#allocation4], 16  }
   0xd   :  { %2093 = vsyncadd [#allocation4], 4294967280 }
   0xe   :  { %47 = sfence }
   0xf   :  { %s48_s18 = sld [smem:[#allocation2]]  ;;  %v1540_v0 = vld [vmem:[%s2614_s2 + $0x80] sm:$0xff]  ;;  %vm184_vm0 = vcmask 39936   ;;  %v54_v5 = vld [vmem:[%s2613_s1 + $0x8] sm:$0x1f]  ;;  %vm62_vm1 = vcmask 1044480  }
  0x10   :  { %v1544_v1 = vld [vmem:[%s2614_s2 + $0xa0] sm:$0xff]  ;;  %1760 = vmatprep.mubr.msk.f32.mxu0 %vm184_vm0, %v1540_v0  ;;  %v55_v6 = vld [vmem:[%s2613_s1 + $0x10] sm:$0x1f]  ;;  %v56_v7 = vld [vmem:[%s2613_s1 + $0x18] sm:$0x1f]  ;;  %v2097_v31 = vmov 0  }
  0x11   :  { %1766 = vmatprep.mubr.msk.f32.mxu1 %vm184_vm0, %v1544_v1  ;;  %v53_v4 = vld [vmem:[%s2613_s1] sm:$0x1f]  ;;  %v1037_v26 = vld [vmem:[%s2615_s3 + $0x10] sm:$0xff]  ;;  %2028 = vset.pattern.permute.xlu0 %v2097_v31  ;;  %v1036_v36 = vld [vmem:[%s2615_s3 + $0x8] sm:$0xff]  ;;  %vm2099_vm2 = vmmov 0   ;;  %vm1339_vm3 = vcmask 523264  }
  0x12   :  { %v1035_v25 = vld [vmem:[%s2615_s3] sm:$0xff]  ;;  %2029 = vset.pattern.permute.xlu1 %v2097_v31  ;;  %v1038_v37 = vld [vmem:[%s2615_s3 + $0x18] sm:$0xff]  ;;  %v1040_v47 = vld [vmem:[%s2615_s3 + $0x28] sm:$0xff]  ;;  %vm1413_vm4 = vcmask 1043456  }
  0x13   :  { %1053 = vperm.xlu0 %2028, %v1035_v25   ;;  %1063 = vperm.xlu1 %2029, %v1037_v26   ;;  %v1039_v46 = vld [vmem:[%s2615_s3 + $0x20] sm:$0xff]  ;;  %v1041_v52 = vld [vmem:[%s2615_s3 + $0x30] sm:$0xff]  ;;  %v1042_v53 = vld [vmem:[%s2615_s3 + $0x38] sm:$0xff] }
  0x14   :  { %v1043_v58 = vld [vmem:[%s2615_s3 + $0x40] sm:$0xff]  ;;  %v1044_v59 = vld [vmem:[%s2615_s3 + $0x48] sm:$0xff]  ;;  %v1045_v60 = vld [vmem:[%s2615_s3 + $0x50] sm:$0xff] }
  0x15   :  { %v49_v2 = vstv %s48_s18  ;;  %v1046_v61 = vld [vmem:[%s2615_s3 + $0x58] sm:$0xff]  ;;  %v1047_v63 = vld [vmem:[%s2615_s3 + $0x60] sm:$0xff]  ;;  %v1048_v0 = vld [vmem:[%s2615_s3 + $0x68] sm:$0xff] }
  0x16   :  { %2030 = vrcp.f32 %v49_v2 }
  0x17   :  { %1058 = vperm.xlu0 %2028, %v1036_v36   ;;  %1068 = vperm.xlu1 %2029, %v1038_v37  }
  0x1b   :  { %1073 = vperm.xlu0 %2028, %v1039_v46   ;;  %1078 = vperm.xlu1 %2029, %v1040_v47  }
  0x1f   :  { %1083 = vperm.xlu0 %2028, %v1041_v52   ;;  %1088 = vperm.xlu1 %2029, %v1042_v53  }
  0x20   :  { %v2031_v3 = vpop.eup %2030 }
  0x21   :  { %2019 = vpush %v2031_v3 }
  0x23   :  { %1093 = vperm.xlu0 %2028, %v1043_v58   ;;  %1098 = vperm.xlu1 %2029, %v1044_v59  }
  0x27   :  { %1103 = vperm.xlu0 %2028, %v1045_v60   ;;  %1108 = vperm.xlu1 %2029, %v1046_v61   ;;  %v1541_v60 = vld [vmem:[%s2614_s2 + $0x88] sm:$0xff] }
  0x28   :  { %v1545_v61 = vld [vmem:[%s2614_s2 + $0xa8] sm:$0xff] }
  0x2b   :  { %1113 = vperm.xlu0 %2028, %v1047_v63   ;;  %1118 = vperm.xlu1 %2029, %v1048_v0  }
  0x52   :  { %s2020_s30 = spop %2019 }
  0x53   :  { %v57_v8 = vstv %s2020_s30 }
  0x54   :  { %v58_v9 = vmul.f32 %v57_v8, %v53_v4  ;;  %v59_v10 = vmul.f32 %v57_v8, %v54_v5  ;;  %v60_v11 = vmul.f32 %v57_v8, %v55_v6  ;;  %v61_v12 = vmul.f32 %v57_v8, %v56_v7 }
  0x56   :  { %v63_v13 = vsel %vm62_vm1, %v58_v9, -inf  ;;  %v70_v14 = vsel %vm62_vm1, %v59_v10, -inf  ;;  %v77_v15 = vsel %vm62_vm1, %v60_v11, -inf  ;;  %v84_v16 = vsel %vm62_vm1, %v61_v12, -inf }
  0x57   :  { %v64_v17 = vrot.slane %v63_v13, 4  ;;  %v71_v18 = vrot.slane %v70_v14, 4  ;;  %v78_v19 = vrot.slane %v77_v15, 4  ;;  %v85_v20 = vrot.slane %v84_v16, 4 }
  0x59   :  { %v65_v21 = vmax.f32 %v63_v13, %v64_v17  ;;  %v72_v22 = vmax.f32 %v70_v14, %v71_v18  ;;  %v79_v23 = vmax.f32 %v77_v15, %v78_v19  ;;  %v86_v24 = vmax.f32 %v84_v16, %v85_v20  ;;  %v1050_v13 = vld [vmem:[%s2615_s3 + $0x78] sm:$0xff] }
  0x5a   :  { %1128 = vperm.xlu1 %2029, %v1050_v13   ;;  %v1551_v13 = vld [vmem:[%s2614_s2 + $0xd8] sm:$0xff] }
  0x5b   :  { %v66_v27 = vrot.slane %v65_v21, 2  ;;  %v73_v28 = vrot.slane %v72_v22, 2  ;;  %v80_v29 = vrot.slane %v79_v23, 2  ;;  %v87_v30 = vrot.slane %v86_v24, 2 }
  0x5d   :  { %v67_v32 = vmax.f32 %v65_v21, %v66_v27  ;;  %v74_v33 = vmax.f32 %v72_v22, %v73_v28  ;;  %v81_v34 = vmax.f32 %v79_v23, %v80_v29  ;;  %v88_v35 = vmax.f32 %v86_v24, %v87_v30  ;;  %v1171_v22 = vld [vmem:[%s2617_s5] sm:$0xff]  ;;  %v1172_v23 = vld [vmem:[%s2617_s5 + $0x8] sm:$0xff] }
  0x5e   :  { %1186 = vperm.xlu1 %2029, %v1172_v23   ;;  %v151_v23 = vld [vmem:[%s2614_s2] sm:$0xff] }
  0x5f   :  { %v68_v38 = vrot.slane %v67_v32, 1  ;;  %v75_v39 = vrot.slane %v74_v33, 1  ;;  %v82_v40 = vrot.slane %v81_v34, 1  ;;  %v89_v41 = vrot.slane %v88_v35, 1 }
  0x61   :  { %v69_v42 = vmax.f32 %v67_v32, %v68_v38  ;;  %v76_v43 = vmax.f32 %v74_v33, %v75_v39  ;;  %v83_v44 = vmax.f32 %v81_v34, %v82_v40  ;;  %v90_v45 = vmax.f32 %v88_v35, %v89_v41  ;;  %v1173_v32 = vld [vmem:[%s2617_s5 + $0x10] sm:$0xff]  ;;  %v1174_v33 = vld [vmem:[%s2617_s5 + $0x18] sm:$0xff]  ;;  %v1175_v38 = vld [vmem:[%s2617_s5 + $0x20] sm:$0xff] }
  0x62   :  { %1196 = vperm.xlu1 %2029, %v1174_v33   ;;  %v1176_v39 = vld [vmem:[%s2617_s5 + $0x28] sm:$0xff]  ;;  %v1177_v40 = vld [vmem:[%s2617_s5 + $0x30] sm:$0xff]  ;;  %v1178_v41 = vld [vmem:[%s2617_s5 + $0x38] sm:$0xff] }
  0x63   :  { %v91_v48 = vsub.f32 %v58_v9, %v69_v42  ;;  %v92_v49 = vsub.f32 %v59_v10, %v76_v43  ;;  %v93_v50 = vsub.f32 %v60_v11, %v83_v44  ;;  %v94_v51 = vsub.f32 %v61_v12, %v90_v45  ;;  %v1049_v12 = vld [vmem:[%s2615_s3 + $0x70] sm:$0xff]  ;;  %v1333_v43 = vld [vmem:[%s2619_s7] sm:$0xf]  ;;  %v156_v33 = vld [vmem:[%s2614_s2 + $0x28] sm:$0xff]  ;;  %s2102_s3 = smov [#allocation5]  }
  0x64   :  { %1123 = vperm.xlu0 %2028, %v1049_v12   ;;  %v1436_v44 = vld [vmem:[%s2620_s8] sm:$0xf]  ;;  %v1593_v12 = vld [vmem:[%s2614_s2 + $0x118] sm:$0xff]  ;;  %s1528_s23 = sshll.u32 %s2102_s3, 4  ;;  %s1529_s23 = int_to_ptr.vmem [resolvable:$true] %s1528_s23 }
  0x65   :  { %v95_v54 = vmul.f32 1.442695, %v91_v48  ;;  %v97_v55 = vmul.f32 1.442695, %v92_v49  ;;  %v99_v56 = vmul.f32 1.442695, %v93_v50  ;;  %p2075_p6 = scmp.lt.s32.totalorder %s1529_s23, %s1529_s23 }
  0x66   :  { %v101_v57 = vmul.f32 1.442695, %v94_v51  ;;  %1206 = vperm.xlu1 %2029, %v1176_v39   ;;  %v159_v39 = vld [vmem:[%s2614_s2 + $0x40] sm:$0xff]  ;;  %s2070_s24 = scalar_lea.vmem %s1529_s23, 64 }
  0x67   :  { %2032 = vpow2.f32 %v95_v54  ;;  %p2071_p5 = scmp.ne.s32.totalorder %s1529_s23, %s2070_s24  ;;  %p2076_p7 = scmp.lt.s32.totalorder %s2070_s24, %s2070_s24 }
  0x68   :  { %2034 = vpow2.f32 %v97_v55  ;;  %1181 = vperm.xlu0 %2028, %v1171_v22   ;;  %v1598_v22 = vld [vmem:[%s2614_s2 + $0x140] sm:$0xff] }
  0x69   :  { %2036 = vpow2.f32 %v99_v56  ;;  %p2077_p8 = por %p2076_p7, %p2075_p6 }
  0x6a   :  { %2038 = vpow2.f32 %v101_v57  ;;  %1216 = vperm.xlu1 %2029, %v1178_v41   ;;  %v160_v41 = vld [vmem:[%s2614_s2 + $0x48] sm:$0xff] }
  0x6b   :  { %p2078_p9 = pnand %p2077_p8, %p2071_p5 }
  0x6c   :  { %1191 = vperm.xlu0 %2028, %v1173_v32   ;;  %v1603_v32 = vld [vmem:[%s2614_s2 + $0x168] sm:$0xff] }
  0x6e   :  { %1439 = vperm.xlu1 %2029, %v1436_v44   ;;  %v1626_v44 = vld [vmem:[%s2614_s2 + $0x198] sm:$0xff] }
  0x70   :  { %1201 = vperm.xlu0 %2028, %v1175_v38   ;;  %v1623_v38 = vld [vmem:[%s2614_s2 + $0x180] sm:$0xff] }
  0x71   :  { %v2221_v62 = vpop.eup %2032 }
  0x72   :  { %v2229_v1 = vpop.eup %2034  ;;  %v103_v2 = vsel %vm62_vm1, %v2221_v62, 0.0 }
  0x73   :  { %v2233_v3 = vpop.eup %2036  ;;  %v104_v4 = vrot.slane %v103_v2, 4  ;;  %v110_v5 = vsel %vm62_vm1, %v2229_v1, 0.0 }
  0x74   :  { %v2237_v6 = vpop.eup %2038  ;;  %v111_v7 = vrot.slane %v110_v5, 4  ;;  %v117_v8 = vsel %vm62_vm1, %v2233_v3, 0.0  ;;  %1211 = vperm.xlu0 %2028, %v1177_v40   ;;  %v1624_v40 = vld [vmem:[%s2614_s2 + $0x188] sm:$0xff] }
  0x75   :  { %v118_v9 = vrot.slane %v117_v8, 4  ;;  %v124_v10 = vsel %vm62_vm1, %v2237_v6, 0.0  ;;  %v105_v11 = vadd.f32 %v104_v4, %v103_v2  ;;  %v1542_v2 = vld [vmem:[%s2614_s2 + $0x90] sm:$0xff]  ;;  %v1543_v4 = vld [vmem:[%s2614_s2 + $0x98] sm:$0xff] }
  0x76   :  { %v112_v14 = vadd.f32 %v111_v7, %v110_v5  ;;  %v125_v15 = vrot.slane %v124_v10, 4  ;;  %v1547_v5 = vld [vmem:[%s2614_s2 + $0xb8] sm:$0xff]  ;;  %v1548_v7 = vld [vmem:[%s2614_s2 + $0xc0] sm:$0xff] }
  0x77   :  { %v106_v16 = vrot.slane %v105_v11, 2  ;;  %v119_v17 = vadd.f32 %v118_v9, %v117_v8  ;;  %v1591_v8 = vld [vmem:[%s2614_s2 + $0x108] sm:$0xff] }
  0x78   :  { %v113_v18 = vrot.slane %v112_v14, 2  ;;  %v126_v19 = vadd.f32 %v125_v15, %v124_v10  ;;  %1336 = vperm.xlu0 %2028, %v1333_v43   ;;  %v1549_v9 = vld [vmem:[%s2614_s2 + $0xc8] sm:$0xff]  ;;  %v1550_v10 = vld [vmem:[%s2614_s2 + $0xd0] sm:$0xff]  ;;  %v1552_v15 = vld [vmem:[%s2614_s2 + $0xe0] sm:$0xff] }
  0x79   :  { %v107_v20 = vadd.f32 %v106_v16, %v105_v11  ;;  %v120_v21 = vrot.slane %v119_v17, 2  ;;  %v1592_v11 = vld [vmem:[%s2614_s2 + $0x110] sm:$0xff]  ;;  %v1595_v16 = vld [vmem:[%s2614_s2 + $0x128] sm:$0xff] }
  0x7a   :  { %v114_v24 = vadd.f32 %v113_v18, %v112_v14  ;;  %v127_v25 = vrot.slane %v126_v19, 2  ;;  %v1594_v14 = vld [vmem:[%s2614_s2 + $0x120] sm:$0xff]  ;;  %v1596_v18 = vld [vmem:[%s2614_s2 + $0x130] sm:$0xff] }
  0x7b   :  { %v108_v26 = vrot.slane %v107_v20, 1  ;;  %v121_v27 = vadd.f32 %v120_v21, %v119_v17  ;;  %v1553_v17 = vld [vmem:[%s2614_s2 + $0xe8] sm:$0xff]  ;;  %v1555_v21 = vld [vmem:[%s2614_s2 + $0xf8] sm:$0xff]  ;;  %v161_v43 = vld [vmem:[%s2614_s2 + $0x50] sm:$0xff] }
  0x7c   :  { %v115_v28 = vrot.slane %v114_v24, 1  ;;  %v128_v29 = vadd.f32 %v127_v25, %v126_v19  ;;  %v1554_v19 = vld [vmem:[%s2614_s2 + $0xf0] sm:$0xff]  ;;  %v152_v25 = vld [vmem:[%s2614_s2 + $0x8] sm:$0xff] }
  0x7d   :  { %v109_v30 = vadd.f32 %v108_v26, %v107_v20  ;;  %v122_v31 = vrot.slane %v121_v27, 1  ;;  %v1597_v20 = vld [vmem:[%s2614_s2 + $0x138] sm:$0xff]  ;;  %v1600_v26 = vld [vmem:[%s2614_s2 + $0x150] sm:$0xff] }
  0x7e   :  { %v116_v34 = vadd.f32 %v115_v28, %v114_v24  ;;  %v129_v35 = vrot.slane %v128_v29, 1  ;;  %v1599_v24 = vld [vmem:[%s2614_s2 + $0x148] sm:$0xff]  ;;  %v1601_v28 = vld [vmem:[%s2614_s2 + $0x158] sm:$0xff] }
  0x7f   :  { %2040 = vrcp.f32 %v109_v30  ;;  %v123_v36 = vadd.f32 %v122_v31, %v121_v27  ;;  %v153_v27 = vld [vmem:[%s2614_s2 + $0x10] sm:$0xff]  ;;  %v155_v31 = vld [vmem:[%s2614_s2 + $0x20] sm:$0xff] }
  0x80   :  { %2042 = vrcp.f32 %v116_v34  ;;  %v130_v37 = vadd.f32 %v129_v35, %v128_v29  ;;  %v154_v29 = vld [vmem:[%s2614_s2 + $0x18] sm:$0xff]  ;;  %v157_v35 = vld [vmem:[%s2614_s2 + $0x30] sm:$0xff] }
  0x81   :  { %2044 = vrcp.f32 %v123_v36 }
  0x82   :  { %2046 = vrcp.f32 %v130_v37 }
  0x89   :  { %v2041_v42 = vpop.eup %2040 }
  0x8a   :  { %v2043_v45 = vpop.eup %2042  ;;  %v135_v46 = vmul.f32 %v2041_v42, %v109_v30  ;;  %v1602_v30 = vld [vmem:[%s2614_s2 + $0x160] sm:$0xff] }
  0x8b   :  { %v2045_v47 = vpop.eup %2044  ;;  %v136_v48 = vmul.f32 %v2043_v45, %v116_v34  ;;  %v1604_v34 = vld [vmem:[%s2614_s2 + $0x170] sm:$0xff] }
  0x8c   :  { %v2047_v49 = vpop.eup %2046  ;;  %v139_v50 = vsub.f32 2.0, %v135_v46  ;;  %v137_v51 = vmul.f32 %v2045_v47, %v123_v36  ;;  %v1605_v36 = vld [vmem:[%s2614_s2 + $0x178] sm:$0xff]  ;;  %v1627_v46 = vld [vmem:[%s2614_s2 + $0x1a0] sm:$0xff] }
  0x8d   :  { %v140_v52 = vsub.f32 2.0, %v136_v48  ;;  %v138_v53 = vmul.f32 %v2047_v49, %v130_v37  ;;  %v158_v37 = vld [vmem:[%s2614_s2 + $0x38] sm:$0xff]  ;;  %v1628_v48 = vld [vmem:[%s2614_s2 + $0x1a8] sm:$0xff] }
  0x8e   :  { %v141_v54 = vsub.f32 2.0, %v137_v51  ;;  %v143_v57 = vmul.f32 %v2041_v42, %v139_v50  ;;  %v1625_v42 = vld [vmem:[%s2614_s2 + $0x190] sm:$0xff] }
  0x8f   :  { %v144_v55 = vmul.f32 %v2043_v45, %v140_v52  ;;  %v142_v56 = vsub.f32 2.0, %v138_v53  ;;  %v162_v45 = vld [vmem:[%s2614_s2 + $0x58] sm:$0xff]  ;;  %v1629_v50 = vld [vmem:[%s2614_s2 + $0x1b0] sm:$0xff] }
  0x90   :  { %v145_v58 = vmul.f32 %v2045_v47, %v141_v54  ;;  %v2297_v0 = vmul.f32 %v2221_v62, %v143_v57  ;;  %v163_v47 = vld [vmem:[%s2614_s2 + $0x60] sm:$0xff]  ;;  %v165_v51 = vld [vmem:[%s2614_s2 + $0x70] sm:$0xff]  ;;  %v1630_v52 = vld [vmem:[%s2614_s2 + $0x1b8] sm:$0xff] }
  0x91   :  { %v2280_v59 = vmul.f32 %v2229_v1, %v144_v55  ;;  %v146_v63 = vmul.f32 %v2047_v49, %v142_v56  ;;  %v164_v49 = vld [vmem:[%s2614_s2 + $0x68] sm:$0xff]  ;;  %v166_v53 = vld [vmem:[%s2614_s2 + $0x78] sm:$0xff]  ;;  %v1631_v54 = vld [vmem:[%s2614_s2 + $0x1c0] sm:$0xff] }
  0x92   :  { %v2300_v1 = vmul.f32 %v2233_v3, %v145_v58  ;;  %v1546_v3 = vld [vmem:[%s2614_s2 + $0xb0] sm:$0xff]  ;;  %v1632_v55 = vld [vmem:[%s2614_s2 + $0x1c8] sm:$0xff]  ;;  %v1634_v57 = vld [vmem:[%s2614_s2 + $0x1d8] sm:$0xff] }
  0x93   :  { %1758 = vmatprep.subr.msk.mxu0 %vm62_vm1, %v2280_v59  ;;  %1969 = vmatprep.subr.msk.mxu1 %vm62_vm1, %v2280_v59  ;;  %v2312_v62 = vmul.f32 %v2237_v6, %v146_v63  ;;  %v1590_v6 = vld [vmem:[%s2614_s2 + $0x100] sm:$0xff]  ;;  %v1633_v56 = vld [vmem:[%s2614_s2 + $0x1d0] sm:$0xff]  ;;  %v1638_v63 = vld [vmem:[%s2614_s2 + $0x1f8] sm:$0xff] }
  0x94   :  { %1759 = vmatpush3.msk.msra.mxu0 %vm62_vm1, %v2280_v59  ;;  %1970 = vmatpush3.msk.msra.mxu1 %vm62_vm1, %v2280_v59  ;;  %v1635_v58 = vld [vmem:[%s2614_s2 + $0x1e0] sm:$0xff] }
  0x95   :  { %1761 = vmatmul.mubr.msk.f32.vlgmr.msra.gmra.mrb[0].mxu0 %vm184_vm0, %v1541_v60  ;;  %1767 = vmatmul.mubr.msk.f32.vlgmr.msra.gmra.mrb[0].mxu1 %vm184_vm0, %v1545_v61  ;;  %v1636_v60 = vld [vmem:[%s2614_s2 + $0x1e8] sm:$0xff]  ;;  %v1637_v61 = vld [vmem:[%s2614_s2 + $0x1f0] sm:$0xff] }
  0x96   :  { %1784 = vmatprep.subr.msk.mxu1 %vm62_vm1, %v2297_v0  ;;  %1810 = vmatprep.subr.msk.mxu0 %vm62_vm1, %v2300_v1 }
  0x97   :  { %1785 = vmatpush3.msk.msra.mxu1 %vm62_vm1, %v2297_v0  ;;  %1811 = vmatpush3.msk.msra.mxu0 %vm62_vm1, %v2300_v1 }
  0x98   :  { %1836 = vmatprep.subr.msk.mxu0 %vm62_vm1, %v2312_v62  ;;  %1763 = vmatprep.mubr.msk.f32.mxu0 %vm184_vm0, %v1542_v2  ;;  %v1163_v2 = vld [vmem:[%s2616_s4] sm:$0xff] }
  0x99   :  { %1769 = vmatprep.mubr.msk.f32.mxu1 %vm184_vm0, %v1546_v3  ;;  %1764 = vmatmul.mubr.msk.f32.gmra.mrb[2].mxu0 %vm184_vm0, %v1543_v4 }
  0x9a   :  { %1770 = vmatmul.mubr.msk.f32.gmra.mrb[2].mxu1 %vm184_vm0, %v1547_v5  ;;  %1812 = vmatprep.mubr.msk.f32.mxu0 %vm184_vm0, %v1590_v6 }
  0x9b   :  { %1772 = vmatprep.mubr.msk.f32.mxu1 %vm184_vm0, %v1548_v7 }
  0x9d   :  { %1813 = vmatmul.mubr.msk.f32.vlgmr.msra.gmra.mrb[4].mxu0 %vm184_vm0, %v1591_v8  ;;  %v1054_v8 = vpop.permute.xlu0 %1053 }
  0x9e   :  { %1773 = vmatmul.mubr.msk.f32.gmra.mrb[4].mxu1 %vm184_vm0, %v1549_v9  ;;  %1837 = vmatpush3.msk.msra.mxu0 %vm62_vm1, %v2312_v62 }
  0x9f   :  { %1775 = vmatprep.mubr.msk.f32.mxu1 %vm184_vm0, %v1550_v10  ;;  %1815 = vmatprep.mubr.msk.f32.mxu0 %vm184_vm0, %v1592_v11 }
  0xa1   :  { %1816 = vmatmul.mubr.msk.f32.gmra.mrb[6].mxu0 %vm184_vm0, %v1593_v12  ;;  %v1064_v12 = vpop.permute.xlu1 %1063 }
  0xa2   :  { %1776 = vmatmul.mubr.msk.f32.gmra.mrb[6].mxu1 %vm184_vm0, %v1551_v13  ;;  %1818 = vmatprep.mubr.msk.f32.mxu0 %vm184_vm0, %v1594_v14 }
  0xa3   :  { %1778 = vmatprep.mubr.msk.f32.mxu1 %vm184_vm0, %v1552_v15 }
  0xa5   :  { %1819 = vmatmul.mubr.msk.f32.gmra.mrb[8].mxu0 %vm184_vm0, %v1595_v16 }
  0xa6   :  { %1779 = vmatmul.mubr.msk.f32.gmra.mrb[8].mxu1 %vm184_vm0, %v1553_v17  ;;  %1821 = vmatprep.mubr.msk.f32.mxu0 %vm184_vm0, %v1596_v18  ;;  %v1059_v17 = vpop.permute.xlu0 %1058 }
  0xa7   :  { %1781 = vmatprep.mubr.msk.f32.mxu1 %vm184_vm0, %v1554_v19  ;;  %v1069_v19 = vpop.permute.xlu1 %1068 }
  0xa9   :  { %1822 = vmatmul.mubr.msk.f32.gmra.mrb[10].mxu0 %vm184_vm0, %v1597_v20 }
  0xaa   :  { %1782 = vmatmul.mubr.msk.f32.gmra.mrb[10].mxu1 %vm184_vm0, %v1555_v21  ;;  %1824 = vmatprep.mubr.msk.f32.mxu0 %vm184_vm0, %v1598_v22  ;;  %v1074_v22 = vpop.permute.xlu0 %1073 }
  0xab   :  { %1786 = vmatprep.mubr.msk.f32.mxu1 %vm184_vm0, %v151_v23 }
  0xad   :  { %1825 = vmatmul.mubr.msk.f32.gmra.mrb[12].mxu0 %vm184_vm0, %v1599_v24  ;;  %v1079_v24 = vpop.permute.xlu1 %1078 }
  0xae   :  { %1787 = vmatmul.mubr.msk.f32.vlgmr.msra.gmra.mrb[12].mxu1 %vm184_vm0, %v152_v25  ;;  %1827 = vmatprep.mubr.msk.f32.mxu0 %vm184_vm0, %v1600_v26 }
  0xaf   :  { %1789 = vmatprep.mubr.msk.f32.mxu1 %vm184_vm0, %v153_v27 }
  0xb1   :  { %1828 = vmatmul.mubr.msk.f32.gmra.mrb[14].mxu0 %vm184_vm0, %v1601_v28 }
  0xb2   :  { %1790 = vmatmul.mubr.msk.f32.gmra.mrb[14].mxu1 %vm184_vm0, %v154_v29  ;;  %1830 = vmatprep.mubr.msk.f32.mxu0 %vm184_vm0, %v1602_v30 }
  0xb3   :  { %1792 = vmatprep.mubr.msk.f32.mxu1 %vm184_vm0, %v155_v31 }
  0xb5   :  { %1831 = vmatmul.mubr.msk.f32.gmra.mrb[16].mxu0 %vm184_vm0, %v1603_v32  ;;  %v1084_v32 = vpop.permute.xlu0 %1083 }
  0xb6   :  { %1793 = vmatmul.mubr.msk.f32.gmra.mrb[0].mxu1 %vm184_vm0, %v156_v33  ;;  %1833 = vmatprep.mubr.msk.f32.mxu0 %vm184_vm0, %v1604_v34 }
  0xb7   :  { %1795 = vmatprep.mubr.msk.f32.mxu1 %vm184_vm0, %v157_v35 }
  0xb9   :  { %1834 = vmatmul.mubr.msk.f32.gmra.mrb[18].mxu0 %vm184_vm0, %v1605_v36 }
  0xba   :  { %1796 = vmatmul.mubr.msk.f32.gmra.mrb[2].mxu1 %vm184_vm0, %v158_v37  ;;  %1838 = vmatprep.mubr.msk.f32.mxu0 %vm184_vm0, %v1623_v38 }
  0xbb   :  { %1798 = vmatprep.mubr.msk.f32.mxu1 %vm184_vm0, %v159_v39  ;;  %v1089_v39 = vpop.permute.xlu1 %1088 }
  0xbd   :  { %1839 = vmatmul.mubr.msk.f32.vlgmr.msra.gmra.mrb[4].mxu0 %vm184_vm0, %v1624_v40 }
  0xbe   :  { %1799 = vmatmul.mubr.msk.f32.gmra.mrb[4].mxu1 %vm184_vm0, %v160_v41  ;;  %1841 = vmatprep.mubr.msk.f32.mxu0 %vm184_vm0, %v1625_v42 }
  0xbf   :  { %1801 = vmatprep.mubr.msk.f32.mxu1 %vm184_vm0, %v161_v43 }
  0xc1   :  { %1842 = vmatmul.mubr.msk.f32.gmra.mrb[6].mxu0 %vm184_vm0, %v1626_v44 }
  0xc2   :  { %1802 = vmatmul.mubr.msk.f32.gmra.mrb[6].mxu1 %vm184_vm0, %v162_v45  ;;  %1844 = vmatprep.mubr.msk.f32.mxu0 %vm184_vm0, %v1627_v46 }
  0xc3   :  { %1804 = vmatprep.mubr.msk.f32.mxu1 %vm184_vm0, %v163_v47 }
  0xc5   :  { %1845 = vmatmul.mubr.msk.f32.gmra.mrb[8].mxu0 %vm184_vm0, %v1628_v48 }
  0xc6   :  { %1805 = vmatmul.mubr.msk.f32.gmra.mrb[8].mxu1 %vm184_vm0, %v164_v49  ;;  %1847 = vmatprep.mubr.msk.f32.mxu0 %vm184_vm0, %v1629_v50 }
  0xc7   :  { %1807 = vmatprep.mubr.msk.f32.mxu1 %vm184_vm0, %v165_v51 }
  0xc9   :  { %1848 = vmatmul.mubr.msk.f32.gmra.mrb[10].mxu0 %vm184_vm0, %v1630_v52 }
  0xca   :  { %1808 = vmatmul.mubr.msk.f32.gmra.mrb[10].mxu1 %vm184_vm0, %v166_v53  ;;  %1850 = vmatprep.mubr.msk.f32.mxu0 %vm184_vm0, %v1631_v54  ;;  %v1094_v54 = vpop.permute.xlu0 %1093 }
  0xcb   :  { %1894 = vmatprep.mubr.f32.mxu1 %v1163_v2 }
  0xcd   :  { %1851 = vmatmul.mubr.msk.f32.gmra.mrb[12].mxu0 %vm184_vm0, %v1632_v55 }
  0xce   :  { %1853 = vmatprep.mubr.msk.f32.mxu0 %vm184_vm0, %v1633_v56  ;;  %v1099_v56 = vpop.permute.xlu1 %1098 }
  0xd1   :  { %1854 = vmatmul.mubr.msk.f32.gmra.mrb[14].mxu0 %vm184_vm0, %v1634_v57 }
  0xd2   :  { %1856 = vmatprep.mubr.msk.f32.mxu0 %vm184_vm0, %v1635_v58 }
  0xd5   :  { %1857 = vmatmul.mubr.msk.f32.gmra.mrb[16].mxu0 %vm184_vm0, %v1636_v60 }
  0xd6   :  { %1859 = vmatprep.mubr.msk.f32.mxu0 %vm184_vm0, %v1637_v61 }
  0xd9   :  { %1860 = vmatmul.mubr.msk.f32.gmra.mrb[18].mxu0 %vm184_vm0, %v1638_v63 }
 0x168   :  { %v1762_v3 = vpop.f32.mrb[0].mxu0 }
 0x169   :  { %v302_v4 = vpop.f32.mrb[1].mxu0 }
 0x16c   :  { %v1765_v5 = vpop.f32.mrb[2].mxu0 }
 0x16d   :  { %v312_v6 = vpop.f32.mrb[3].mxu0 }
 0x181   :  { %v1788_v7 = vpop.f32.mrb[12].mxu1 }
 0x182   :  { %v504_v9 = vadd.f32 %v1788_v7, %v1762_v3  ;;  %v498_v10 = vpop.f32.mrb[13].mxu1 }
 0x183   :  { %v499_v11 = vadd.f32 %v498_v10, %v302_v4 }
 0x185   :  { %v1791_v13 = vpop.f32.mrb[14].mxu1 }
 0x186   :  { %v514_v14 = vadd.f32 %v1791_v13, %v1765_v5  ;;  %v508_v15 = vpop.f32.mrb[15].mxu1 }
 0x187   :  { %v509_v16 = vadd.f32 %v508_v15, %v312_v6 }
 0x189   :  { %v1794_v18 = vpop.f32.mrb[0].mxu1 }
 0x18a   :  { %v518_v20 = vpop.f32.mrb[1].mxu1 }
 0x18d   :  { %v1797_v21 = vpop.f32.mrb[2].mxu1 }
 0x18e   :  { %v528_v23 = vpop.f32.mrb[3].mxu1 }
 0x190   :  { %v1840_v25 = vpop.f32.mrb[4].mxu0 }
 0x191   :  { %v1800_v26 = vpop.f32.mrb[4].mxu1  ;;  %v1972_v27 = vadd.f32 %v1840_v25, %v504_v9  ;;  %v940_v28 = vpop.f32.mrb[5].mxu0 }
 0x192   :  { %v538_v29 = vpop.f32.mrb[5].mxu1  ;;  %v1974_v30 = vadd.f32 %v940_v28, %v499_v11 }
 0x193   :  { %v1132_v31 = vadd.f32 %v1972_v27, %v1059_v17  ;;  %v1104_v17 = vpop.permute.xlu0 %1103 }
 0x194   :  { %v1131_v33 = vadd.f32 %v1974_v30, %v1054_v8  ;;  %v1843_v34 = vpop.f32.mrb[6].mxu0 }
 0x195   :  { %v1148_v35 = vmax.f32 %v1132_v31, 0.0  ;;  %v1803_v36 = vpop.f32.mrb[6].mxu1  ;;  %v1976_v37 = vadd.f32 %v1843_v34, %v514_v14  ;;  %v950_v38 = vpop.f32.mrb[7].mxu0 }
 0x196   :  { %v1147_v40 = vmax.f32 %v1131_v33, 0.0  ;;  %v548_v41 = vpop.f32.mrb[7].mxu1  ;;  %v1978_v42 = vadd.f32 %v950_v38, %v509_v16  ;;  %v1109_v14 = vpop.permute.xlu1 %1108 }
 0x197   :  { %v1134_v43 = vadd.f32 %v1976_v37, %v1069_v19 }
 0x198   :  { %v1133_v44 = vadd.f32 %v1978_v42, %v1064_v12  ;;  %v1846_v45 = vpop.f32.mrb[8].mxu0  ;;  %v1925_v46 = vpack.c.bf16 %v1148_v35, %v1147_v40 }
 0x199   :  { %v1150_v47 = vmax.f32 %v1134_v43, 0.0  ;;  %v1806_v48 = vpop.f32.mrb[8].mxu1  ;;  %v1979_v49 = vadd.f32 %v1846_v45, %v1794_v18  ;;  %v960_v50 = vpop.f32.mrb[9].mxu0 }
 0x19a   :  { %v1149_v51 = vmax.f32 %v1133_v44, 0.0  ;;  %v558_v52 = vpop.f32.mrb[9].mxu1  ;;  %v1980_v53 = vadd.f32 %v960_v50, %v518_v20  ;;  %1926 = vmatprep.subr.bf16.mxu1 %v1925_v46 }
 0x19b   :  { %v1136_v55 = vadd.f32 %v1979_v49, %v1079_v24  ;;  %1928 = vmatpush3.bf16.msra.mxu1 %v1925_v46 }
 0x19c   :  { %v1135_v57 = vadd.f32 %v1980_v53, %v1074_v22  ;;  %v1849_v58 = vpop.f32.mrb[10].mxu0  ;;  %v1929_v60 = vpack.c.bf16 %v1150_v47, %v1149_v51 }
 0x19d   :  { %v1152_v61 = vmax.f32 %v1136_v55, 0.0  ;;  %v1809_v63 = vpop.f32.mrb[10].mxu1  ;;  %v1981_v2 = vadd.f32 %v1849_v58, %v1797_v21  ;;  %v970_v3 = vpop.f32.mrb[11].mxu0  ;;  %v1164_v55 = vld [vmem:[%s2616_s4 + $0x8] sm:$0xff]  ;;  %v1167_v58 = vld [vmem:[%s2616_s4 + $0x20] sm:$0xff] }
 0x19e   :  { %v1151_v4 = vmax.f32 %v1135_v57, 0.0  ;;  %v568_v5 = vpop.f32.mrb[11].mxu1  ;;  %v1982_v6 = vadd.f32 %v970_v3, %v528_v23  ;;  %1930 = vmatprep.subr.bf16.mxu1 %v1929_v60  ;;  %v1166_v57 = vld [vmem:[%s2616_s4 + $0x18] sm:$0xff]  ;;  %v2100_v3 = vmov 0.0  }
 0x19f   :  { %v1138_v7 = vadd.f32 %v1981_v2, %v1089_v39  ;;  %1932 = vmatpush3.bf16.msra.mxu1 %v1929_v60  ;;  %v1168_v60 = vld [vmem:[%s2616_s4 + $0x28] sm:$0xff]  ;;  %v2098_v2 = vmov 0.0|0.0  }
 0x1a0   :  { %v1137_v8 = vadd.f32 %v1982_v6, %v1084_v32  ;;  %v1852_v9 = vpop.f32.mrb[12].mxu0  ;;  %v1933_v10 = vpack.c.bf16 %v1152_v61, %v1151_v4  ;;  %v1169_v61 = vld [vmem:[%s2616_s4 + $0x30] sm:$0xff] }
 0x1a1   :  { %v1154_v11 = vmax.f32 %v1138_v7, 0.0  ;;  %v1983_v12 = vadd.f32 %v1852_v9, %v1800_v26  ;;  %v980_v13 = vpop.f32.mrb[13].mxu0  ;;  %v1119_v26 = vpop.permute.xlu1 %1118 }
 0x1a2   :  { %v1153_v15 = vmax.f32 %v1137_v8, 0.0  ;;  %v1984_v16 = vadd.f32 %v980_v13, %v538_v29  ;;  %1934 = vmatprep.subr.bf16.mxu1 %v1933_v10  ;;  %v1114_v29 = vpop.permute.xlu0 %1113 }
 0x1a3   :  { %v1140_v18 = vadd.f32 %v1983_v12, %v1099_v56  ;;  %1936 = vmatpush3.bf16.msra.mxu1 %v1933_v10  ;;  %v1165_v56 = vld [vmem:[%s2616_s4 + $0x10] sm:$0xff] }
 0x1a4   :  { %v1139_v19 = vadd.f32 %v1984_v16, %v1094_v54  ;;  %v1855_v20 = vpop.f32.mrb[14].mxu0  ;;  %v1937_v21 = vpack.c.bf16 %v1154_v11, %v1153_v15 }
 0x1a5   :  { %v1156_v22 = vmax.f32 %v1140_v18, 0.0  ;;  %v1985_v23 = vadd.f32 %v1855_v20, %v1803_v36  ;;  %v990_v24 = vpop.f32.mrb[15].mxu0  ;;  %v1129_v45 = vpop.permute.xlu1 %1128 }
 0x1a6   :  { %v1155_v25 = vmax.f32 %v1139_v19, 0.0  ;;  %v1986_v27 = vadd.f32 %v990_v24, %v548_v41  ;;  %1938 = vmatprep.subr.bf16.mxu1 %v1937_v21  ;;  %v1124_v49 = vpop.permute.xlu0 %1123 }
 0x1a7   :  { %v1142_v28 = vadd.f32 %v1985_v23, %v1109_v14  ;;  %1940 = vmatpush3.bf16.msra.mxu1 %v1937_v21 }
 0x1a8   :  { %v1141_v30 = vadd.f32 %v1986_v27, %v1104_v17  ;;  %v1858_v31 = vpop.f32.mrb[16].mxu0  ;;  %v1941_v32 = vpack.c.bf16 %v1156_v22, %v1155_v25 }
 0x1a9   :  { %v1158_v33 = vmax.f32 %v1142_v28, 0.0  ;;  %v1987_v34 = vadd.f32 %v1858_v31, %v1806_v48  ;;  %v1000_v35 = vpop.f32.mrb[17].mxu0  ;;  %v1187_v4 = vpop.permute.xlu1 %1186 }
 0x1aa   :  { %v1157_v37 = vmax.f32 %v1141_v30, 0.0  ;;  %v1988_v38 = vadd.f32 %v1000_v35, %v558_v52  ;;  %1942 = vmatprep.subr.bf16.mxu1 %v1941_v32 }
 0x1ab   :  { %v1144_v39 = vadd.f32 %v1987_v34, %v1119_v26  ;;  %1944 = vmatpush3.bf16.msra.mxu1 %v1941_v32 }
 0x1ac   :  { %v1143_v36 = vadd.f32 %v1988_v38, %v1114_v29  ;;  %v1861_v40 = vpop.f32.mrb[18].mxu0  ;;  %v1945_v42 = vpack.c.bf16 %v1158_v33, %v1157_v37 }
 0x1ad   :  { %v1160_v41 = vmax.f32 %v1144_v39, 0.0  ;;  %v1989_v43 = vadd.f32 %v1861_v40, %v1809_v63  ;;  %v1010_v44 = vpop.f32.mrb[19].mxu0  ;;  %v1170_v63 = vld [vmem:[%s2616_s4 + $0x38] sm:$0xff]  ;;  %v1197_v6 = vpop.permute.xlu1 %1196  ;;  %v1332_v40 = vld [vmem:[%s2618_s6] sm:$0xf]  ;;  %s1539_s6 = sld [smem:[#allocation2 + $0x1]] }
 0x1ae   :  { %v1159_v46 = vmax.f32 %v1143_v36, 0.0  ;;  %v1990_v47 = vadd.f32 %v1010_v44, %v568_v5  ;;  %1946 = vmatprep.subr.bf16.mxu1 %v1945_v42  ;;  %v1182_v5 = vpop.permute.xlu0 %1181 }
 0x1af   :  { %v1146_v50 = vadd.f32 %v1989_v43, %v1129_v45  ;;  %1948 = vmatpush3.bf16.msra.mxu1 %v1945_v42 }
 0x1b0   :  { %v1145_v48 = vadd.f32 %v1990_v47, %v1124_v49  ;;  %v1949_v51 = vpack.c.bf16 %v1160_v41, %v1159_v46 }
 0x1b1   :  { %v1162_v53 = vmax.f32 %v1146_v50, 0.0  ;;  %v1207_v17 = vpop.permute.xlu1 %1206 }
 0x1b2   :  { %v1161_v52 = vmax.f32 %v1145_v48, 0.0  ;;  %1950 = vmatprep.subr.bf16.mxu1 %v1949_v51  ;;  %v1192_v8 = vpop.permute.xlu0 %1191 }
 0x1b3   :  { %1952 = vmatpush3.bf16.msra.mxu1 %v1949_v51 }
 0x1b4   :  { %v1953_v54 = vpack.c.bf16 %v1162_v53, %v1161_v52 }
 0x1b5   :  { %v1217_v30 = vpop.permute.xlu1 %1216 }
 0x1b6   :  { %1954 = vmatprep.subr.bf16.mxu1 %v1953_v54  ;;  %v1202_v20 = vpop.permute.xlu0 %1201 }
 0x1b7   :  { %1956 = vmatpush3.bf16.msra.mxu1 %v1953_v54 }
 0x1b8   :  { %1957 = vmatprep.subr.bf16.mxu1 %v2098_v2 }
 0x1ba   :  { %1895 = vmatmul.mubr.f32.vlgmr.msra.gmra.mrb[16].mxu1 %v1164_v55  ;;  %v1212_v29 = vpop.permute.xlu0 %1211 }
 0x1bb   :  { %1897 = vmatprep.mubr.f32.mxu1 %v1165_v56 }
 0x1be   :  { %1898 = vmatmul.mubr.f32.gmra.mrb[18].mxu1 %v1166_v57  ;;  %v1337_v42 = vpop.permute.xlu0 %1336 }
 0x1bf   :  { %1900 = vmatprep.mubr.f32.mxu1 %v1167_v58 }
 0x1c2   :  { %1901 = vmatmul.mubr.f32.gmra.mrb[20].mxu1 %v1168_v60 }
 0x1c3   :  { %1903 = vmatprep.mubr.f32.mxu1 %v1169_v61 }
 0x1c6   :  { %1904 = vmatmul.mubr.f32.gmra.mrb[22].mxu1 %v1170_v63 }
 0x1c7   :  { %1922 = vmatprep.mubr.msk.f32.mxu1 %vm2099_vm2, %v2100_v3 }
 0x28d   :  { %v1896_v7 = vpop.f32.mrb[16].mxu1 }
 0x28e   :  { %v1291_v9 = vadd.f32 %v1896_v7, %v1187_v4  ;;  %v1285_v10 = vpop.f32.mrb[17].mxu1  ;;  %v1440_v7 = vpop.permute.xlu1 %1439 }
 0x28f   :  { %v1286_v11 = vadd.f32 %v1285_v10, %v1182_v5 }
 0x290   :  { %v1325_v12 = vmax.f32 %v1291_v9, 0.0 }
 0x291   :  { %v1324_v13 = vmax.f32 %v1286_v11, 0.0  ;;  %v1899_v14 = vpop.f32.mrb[18].mxu1 }
 0x292   :  { %v1301_v15 = vadd.f32 %v1899_v14, %v1197_v6  ;;  %v1295_v16 = vpop.f32.mrb[19].mxu1 }
 0x293   :  { %v1958_v18 = vpack.c.bf16 %v1325_v12, %v1324_v13  ;;  %v1296_v19 = vadd.f32 %v1295_v16, %v1192_v8  ;;  %v1443_v8 = vstv %s1539_s6 }
 0x294   :  { %v1327_v21 = vmax.f32 %v1301_v15, 0.0 }
 0x295   :  { %v1326_v22 = vmax.f32 %v1296_v19, 0.0  ;;  %v1902_v23 = vpop.f32.mrb[20].mxu1  ;;  %1959 = vmatpush3.bf16.msra.mxu1 %v1958_v18 }
 0x296   :  { %v1311_v24 = vadd.f32 %v1902_v23, %v1207_v17  ;;  %v1305_v25 = vpop.f32.mrb[21].mxu1  ;;  %1960 = vmatprep.subr.bf16.mxu1 %v2098_v2 }
 0x297   :  { %v1961_v27 = vpack.c.bf16 %v1327_v21, %v1326_v22  ;;  %v1306_v28 = vadd.f32 %v1305_v25, %v1202_v20  ;;  %v2101_v20 = vmov 1966171168   ;;  %v1464_v22 = vlaneseq }
 0x298   :  { %v1329_v26 = vmax.f32 %v1311_v24, 0.0  ;;  %v1462_v21 = vunpack.c.l.s4 %v2101_v20 }
 0x299   :  { %v1328_v31 = vmax.f32 %v1306_v28, 0.0  ;;  %v1905_v32 = vpop.f32.mrb[22].mxu1  ;;  %1962 = vmatpush3.bf16.msra.mxu1 %v1961_v27  ;;  %v1465_v27 = vshrl.u32 %v1464_v22, 7 }
 0x29a   :  { %v1321_v33 = vadd.f32 %v1905_v32, %v1217_v30  ;;  %v1315_v34 = vpop.f32.mrb[23].mxu1  ;;  %1963 = vmatprep.subr.bf16.mxu1 %v2098_v2  ;;  %v1463_v25 = vunpack.c.0.s8 %v1462_v21 }
 0x29b   :  { %v1964_v35 = vpack.c.bf16 %v1329_v26, %v1328_v31  ;;  %v1316_v37 = vadd.f32 %v1315_v34, %v1212_v29  ;;  %v1487_v29 = vsub.s32 0, %v1465_v27 }
 0x29c   :  { %v1331_v38 = vmax.f32 %v1321_v33, 0.0  ;;  %v1466_v30 = vsub.s32 %v1463_v25, %v1465_v27 }
 0x29d   :  { %v1330_v39 = vmax.f32 %v1316_v37, 0.0  ;;  %1965 = vmatpush3.bf16.msra.mxu1 %v1964_v35 }
 0x29e   :  { %1966 = vmatprep.subr.bf16.mxu1 %v2098_v2 }
 0x29f   :  { %v1967_v36 = vpack.c.bf16 %v1331_v38, %v1330_v39 }
 0x2a1   :  { %1968 = vmatpush3.bf16.msra.mxu1 %v1967_v36 }
 0x2a4   :  { %1923 = vmatmul.mubr.msk.f32.vlgmr.msra.gmra.mrb[24].mxu1 %vm1339_vm3, %v1332_v40 }
 0x377   :  { %v1409_v41 = vpop.f32.mrb[24].mxu1 }
 0x378   :  { %v1410_v43 = vadd.f32 %v1409_v41, %v1337_v42  ;;  %v1924_v44 = vpop.f32.mrb[25].mxu1 }
 0x37a   :  { %v1414_v45 = vsel %vm1413_vm4, %v1410_v43, -inf }
 0x37b   :  { %v1415_v46 = vrot.slane %v1414_v45, 4 }
 0x37d   :  { %v1416_v47 = vmax.f32 %v1414_v45, %v1415_v46 }
 0x37f   :  { %v1417_v49 = vrot.slane %v1416_v47, 2 }
 0x381   :  { %v1418_v50 = vmax.f32 %v1416_v47, %v1417_v49 }
 0x383   :  { %v1419_v48 = vrot.slane %v1418_v50, 1 }
 0x385   :  { %v1420_v51 = vmax.f32 %v1418_v50, %v1419_v48 }
 0x387   :  { %v1421_v53 = vsub.f32 %v1410_v43, %v1420_v51 }
 0x389   :  { %v1422_v52 = vmul.f32 1.442695, %v1421_v53 }
 0x38b   :  { %2048 = vpow2.f32 %v1422_v52 }
 0x395   :  { %v2049_v54 = vpop.eup %2048 }
 0x396   :  { %v1424_v55 = vsel %vm1413_vm4, %v2049_v54, 0.0 }
 0x397   :  { %v1425_v56 = vrot.slane %v1424_v55, 4 }
 0x399   :  { %v1426_v57 = vadd.f32 %v1425_v56, %v1424_v55 }
 0x39b   :  { %v1427_v58 = vrot.slane %v1426_v57, 2 }
 0x39d   :  { %v1428_v60 = vadd.f32 %v1427_v58, %v1426_v57 }
 0x39f   :  { %v1429_v61 = vrot.slane %v1428_v60, 1 }
 0x3a1   :  { %v1430_v63 = vadd.f32 %v1429_v61, %v1428_v60 }
 0x3a3   :  { %2050 = vrcp.f32 %v1430_v63 }
 0x3ad   :  { %v2051_v2 = vpop.eup %2050 }
 0x3ae   :  { %v1432_v3 = vmul.f32 %v2051_v2, %v1430_v63 }
 0x3b0   :  { %v1433_v4 = vsub.f32 2.0, %v1432_v3 }
 0x3b2   :  { %v1434_v5 = vmul.f32 %v2051_v2, %v1433_v4 }
 0x3b4   :  { %v1435_v6 = vmul.f32 %v2049_v54, %v1434_v5 }
 0x3b6   :  { %v1442_v9 = vmul.f32 %v1440_v7, %v1435_v6 }
 0x3b8   :  { %v1444_v10 = vsub.f32 %v1442_v9, %v1443_v8 }
 0x3ba   :  { %v1445_v11 = vmul.f32 1.442695, %v1444_v10 }
 0x3bc   :  { %2052 = vpow2.f32 %v1445_v11 }
 0x3c6   :  { %v2053_v12 = vpop.eup %2052 }
 0x3c7   :  { %v1447_v13 = vsel %vm1413_vm4, %v2053_v12, 0.0 }
 0x3c8   :  { %v1448_v14 = vrot.slane %v1447_v13, 4 }
 0x3ca   :  { %v1449_v15 = vadd.f32 %v1448_v14, %v1447_v13 }
 0x3cc   :  { %v1450_v16 = vrot.slane %v1449_v15, 2 }
 0x3ce   :  { %v1451_v17 = vadd.f32 %v1450_v16, %v1449_v15 }
 0x3d0   :  { %v1452_v18 = vrot.slane %v1451_v17, 1 }
 0x3d2   :  { %v1453_v19 = vadd.f32 %v1452_v18, %v1451_v17 }
 0x3d4   :  { %2054 = vrcp.f32 %v1453_v19 }
 0x3de   :  { %v2055_v23 = vpop.eup %2054 }
 0x3df   :  { %v1455_v24 = vmul.f32 %v2055_v23, %v1453_v19 }
 0x3e1   :  { %v1456_v28 = vsub.f32 2.0, %v1455_v24 }
 0x3e3   :  { %v1457_v26 = vmul.f32 %v2055_v23, %v1456_v28 }
 0x3e5   :  { %v1458_v31 = vmul.f32 %v2053_v12, %v1457_v26 }
 0x3e7   :  { %1459 = vst [vmem:[#allocation5] sm:$0xf] %v1458_v31  ;;  %v1467_v32 = vrot.slane %v1458_v31, %v1466_v30 }
 0x3e8   :  { %2081 = shalt.err (!%p2078_p9)
}
 0x3e9   :  { %s2082_s27 = scalar_lea.hbm %s2622_s10, 64 }
 0x3ea   :  { %p2083_p10 = scmp.ne.s32.totalorder %s2622_s10, %s2082_s27  ;;  %p2086_p11 = scmp.lt.u32.totalorder %s2082_s27, %s2622_s10 }
 0x3ec   :  { %p2088_p12 = pnand %p2086_p11, %p2083_p10 }
 0x3ee   :  { %2091 = shalt.err (!%p2088_p12)
}
 0x3ef   :  { %1531 = dma.vmem_to_hbm [thread:$0]  %s1529_s23, 64, %s2622_s10, [#allocation3]   ;;  %v1468_v33 = vcombine.high %v1467_v32, %v1467_v32  ;;  %v1475_v34 = vrot.slane %v1467_v32, %v1466_v30 }
 0x3f1   :  { %v1482_v35 = vrot.slane %v1468_v33, %v1466_v30  ;;  %v1483_v37 = vcombine.high %v1475_v34, %v1475_v34  ;;  %v1488_v38 = vrot.slane %v1475_v34, %v1487_v29 }
 0x3f3   :  { %v1484_v39 = vcombine.high %v1482_v35, %v1482_v35  ;;  %v1492_v36 = vrot.slane %v1482_v35, %v1487_v29  ;;  %v1496_v40 = vrot.slane %v1483_v37, %v1487_v29  ;;  %v1505_v42 = vmul.f32 %v1488_v38, %v2297_v0 }
 0x3f5   :  { %v1500_v41 = vrot.slane %v1484_v39, %v1487_v29  ;;  %v1506_v43 = vmul.f32 %v1492_v36, %v2280_v59  ;;  %v1507_v44 = vmul.f32 %v1496_v40, %v2300_v1  ;;  %v1509_v46 = vsel %vm62_vm1, %v1505_v42, 0.0 }
 0x3f7   :  { %v1508_v45 = vmul.f32 %v1500_v41, %v2312_v62  ;;  %v1510_v47 = vsel %vm62_vm1, %v1506_v43, 0.0  ;;  %v1512_v50 = vsel %vm62_vm1, %v1507_v44, 0.0 }
 0x3f8   :  { %v1511_v49 = vadd.f32 %v1510_v47, %v1509_v46 }
 0x3f9   :  { %v1514_v51 = vsel %vm62_vm1, %v1508_v45, 0.0 }
 0x3fa   :  { %v1513_v48 = vadd.f32 %v1512_v50, %v1511_v49 }
 0x3fc   :  { %v1515_v53 = vadd.f32 %v1514_v51, %v1513_v48 }
 0x3fe   :  { %v1516_v52 = vadd.f32 1e-08, %v1515_v53 }
 0x400   :  { %2056 = vlog2.f32 %v1516_v52 }
 0x40a   :  { %v2057_v0 = vpop.eup %2056 }
 0x40b   :  { %v1518_v54 = vmul.f32 0.6931472, %v2057_v0 }
 0x40d   :  { %1519 = vst [vmem:[%s2621_s9] sm:$0x1f] %v1518_v54 }
 0x40e   :  { %2094 = dma.done.wait [#allocation3], 64  }
 0x40f   :  { %2095 = vsyncadd [#allocation3], 4294967232 }
 0x410   :  { %1537 = vsyncpa [#allocation3], 1 }
 0x411   :  { %1538 = vsyncpa [#allocation4], 1 }

</bundles_post_ra>
